<compile_context>
chip_gen: v6e
topology: v6e:2x2x1
jax: 0.10.0
libtpu: 0.0.40
codegen_flags: <defaults>
</compile_context>

<pallas_src>
import math
from functools import partial

import jax
import jax.numpy as jnp
import numpy as np
from jax.experimental import pallas as pl
from jax.experimental.pallas import tpu as pltpu


def _round_up(v, m):
    return (v + m - 1) // m * m


# Activations whose value at 0 is non-finite -> padded intermediate columns
# (which are exactly 0) would inject inf/NaN and need masking on the last tile.
_NONFINITE_AT_ZERO = frozenset({"log", "acosh"})


def _num_tensorcores():
    """Best-effort TensorCore count (v7x has 2 per chip)."""
    try:
        dev = jax.devices()[0]
        if dev.platform == "tpu" and "v7" in dev.device_kind.lower():
            return 2
    except Exception:
        pass
    return 1


def _default_vmem_limit():
    """Chip-aware scoped-VMEM budget (leave headroom under physical)."""
    try:
        info = pltpu.get_tpu_info()
        return int(min(info.vmem_capacity_bytes * 7 // 8, 100 * 1024 * 1024))
    except Exception:
        return 64 * 1024 * 1024


# ---------------------------------------------------------------------------
# Elementwise activation library (f32 in / f32 out). swiglu & grn are special.
# ---------------------------------------------------------------------------
def _apply_activation(h, activation, *, clamp_min, clamp_max, alpha):
    if activation == "abs":
        return jnp.abs(h)
    if activation == "acos":
        return jnp.arccos(h)
    if activation == "asin":
        return jnp.arcsin(h)
    if activation == "atan":
        return jnp.arctan(h)
    if activation == "acosh":
        return jnp.arccosh(h)
    if activation == "asinh":
        return jnp.arcsinh(h)
    if activation == "atanh":
        return jnp.arctanh(h)
    if activation == "ceiling":
        return jnp.ceil(h)
    if activation == "clamp":
        return jnp.clip(h, clamp_min, clamp_max)
    if activation == "cos":
        return jnp.cos(h)
    if activation == "cosh":
        return jnp.cosh(h)
    if activation == "erf":
        return jax.lax.erf(h)
    if activation == "elu":
        return jnp.where(h > 0.0, h, alpha * (jnp.exp(h) - 1.0))
    if activation == "exp":
        return jnp.exp(h)
    if activation == "floor":
        return jnp.floor(h)
    if activation == "gelu":  # torch gelu(approximate='tanh')
        c = math.sqrt(2.0 / math.pi)
        return 0.5 * h * (1.0 + jnp.tanh(c * (h + 0.044715 * h * h * h)))
    if activation == "log":
        return jnp.log(h)
    if activation == "negative":
        return -h
    if activation == "relu":
        return jnp.maximum(h, 0.0)
    if activation == "round":
        return jnp.round(h)
    if activation == "sigmoid":
        return jax.nn.sigmoid(h)
    if activation == "sign":
        return jnp.sign(h)
    if activation == "sin":
        return jnp.sin(h)
    if activation == "sinh":
        return jnp.sinh(h)
    if activation == "softplus":
        return jnp.logaddexp(h, 0.0)
    if activation == "softsign":
        return h / (1.0 + jnp.abs(h))
    if activation == "sqrt":
        return jnp.sqrt(h)
    if activation == "tan":
        return jnp.tan(h)
    if activation == "tanh":
        return jnp.tanh(h)
    if activation == "hsigmoid":
        return jnp.clip(h / 6.0 + 0.5, 0.0, 1.0)
    if activation == "hswish":
        return h * jnp.clip(h / 6.0 + 0.5, 0.0, 1.0)
    if activation == "mish":
        return h * jnp.tanh(jnp.logaddexp(h, 0.0))
    raise ValueError(f"Unsupported activation: {activation}")


# ---------------------------------------------------------------------------
# Kernels. grid = (M_pad//tm, I_pad//tn); j (intermediate dim) is a reduction.
# x_ref arrives pre-cast to the weight dtype; all dots accumulate in f32.
# ---------------------------------------------------------------------------
def _mlp_act_kernel(x_ref, w1_ref, w2_ref, o_ref, acc_ref, *, activation,
                    clamp_min, clamp_max, alpha, tn, i_size, mask_tail):
    j = pl.program_id(1)

    h = jnp.dot(x_ref[...], w1_ref[...], preferred_element_type=jnp.float32)
    a = _apply_activation(h, activation, clamp_min=clamp_min,
                          clamp_max=clamp_max, alpha=alpha)
    if mask_tail:
        # Only activations with non-finite act(0) need this (log/acosh); padded
        # columns are only present in the last j tile (I_pad - I < 128 <= tn),
        # earlier tiles see an all-true mask (semantically a no-op).
        col = jax.lax.broadcasted_iota(jnp.int32, a.shape, 1) + j * tn
        a = jnp.where(col < i_size, a, 0.0)

    part = jnp.dot(a.astype(w2_ref.dtype), w2_ref[...],
                   preferred_element_type=jnp.float32)

    @pl.when(j == 0)
    def _():
        acc_ref[...] = part          # init with first partial (no zero-fill)

    @pl.when(j > 0)
    def _():
        acc_ref[...] += part

    @pl.when(j == pl.num_programs(1) - 1)
    def _():
        o_ref[...] = acc_ref[...].astype(o_ref.dtype)


def _mlp_swiglu_kernel(x_ref, w1g_ref, w2_ref, o_ref, acc_ref, *, tn):
    """w1g_ref tile holds [w1_tile | wg_tile] -> one wide MXU push per step."""
    j = pl.program_id(1)

    hg = jnp.dot(x_ref[...], w1g_ref[...], preferred_element_type=jnp.float32)
    h = hg[:, :tn]
    g = hg[:, tn:]
    a = (h * jax.nn.sigmoid(h)) * g           # silu(l1(x)) * swiglu(x)

    part = jnp.dot(a.astype(w2_ref.dtype), w2_ref[...],
                   preferred_element_type=jnp.float32)

    @pl.when(j == 0)
    def _():
        acc_ref[...] = part

    @pl.when(j > 0)
    def _():
        acc_ref[...] += part

    @pl.when(j == pl.num_programs(1) - 1)
    def _():
        o_ref[...] = acc_ref[...].astype(o_ref.dtype)


def _mlp_grn_kernel(x_ref, w1_ref, w2_ref, o_ref, acc_ref, ss_ref, *, grn_eps):
    """F.normalize(h, dim=-1): out = (h @ w2) / max(||h||_2, eps).
    The norm is a per-row scalar, so it distributes through the second matmul
    and I can be tiled like every other activation."""
    j = pl.program_id(1)

    h = jnp.dot(x_ref[...], w1_ref[...], preferred_element_type=jnp.float32)
    part = jnp.dot(h.astype(w2_ref.dtype), w2_ref[...],
                   preferred_element_type=jnp.float32)
    ssq = jnp.sum(h * h, axis=-1, keepdims=True)

    @pl.when(j == 0)
    def _():
        acc_ref[...] = part
        ss_ref[...] = ssq

    @pl.when(j > 0)
    def _():
        acc_ref[...] += part
        ss_ref[...] += ssq

    @pl.when(j == pl.num_programs(1) - 1)
    def _():
        norm = jnp.maximum(jnp.sqrt(ss_ref[...]), grn_eps)
        o_ref[...] = (acc_ref[...] / norm).astype(o_ref.dtype)


# ---------------------------------------------------------------------------
# One-time weight preparation (hoisted out of the forward path).
# ---------------------------------------------------------------------------
def mlp_prepare(w1, w2, *, wg=None, tn=512, w_dtype=jnp.bfloat16):
    """Pad to (8,128)-aligned shapes, cast to the MXU operand dtype and repack
    w1 (+ swiglu gate) block-major so every per-step weight DMA is contiguous.

    Note: w_dtype=bf16 is an explicit accuracy/speed choice (f32 accumulation);
    pass w_dtype=jnp.float32 for bit-closer-to-PyTorch results."""
    H, I = w1.shape
    assert w2.shape == (I, H)
    H_pad = _round_up(H, 128)
    I_pad = _round_up(I, 128)            # pad I only to 128, never up to tn
    tn = max(128, (min(tn, I_pad) // 128) * 128)
    while I_pad % tn:                    # tn must divide I_pad (128 always does)
        tn -= 128
    nj = I_pad // tn

    def pad_cast(w, rows, cols):
        return jnp.pad(w, ((0, rows - w.shape[0]),
                           (0, cols - w.shape[1]))).astype(w_dtype)

    # block-major: block j = w1[:, j*tn:(j+1)*tn]  ->  shape (nj, H_pad, tn)
    w1_blk = pad_cast(w1, H_pad, I_pad).reshape(H_pad, nj, tn).transpose(1, 0, 2)
    if wg is not None:
        assert wg.shape == (H, I)
        wg_blk = pad_cast(wg, H_pad, I_pad).reshape(H_pad, nj, tn).transpose(1, 0, 2)
        w1_blk = jnp.concatenate([w1_blk, wg_blk], axis=2)   # (nj, H_pad, 2*tn)
    w2p = pad_cast(w2, I_pad, H_pad)                         # (I_pad, H_pad)

    return dict(w1_blocks=w1_blk, w2=w2p, hidden=H, inter=I,
                h_pad=H_pad, i_pad=I_pad, tn=tn, swiglu=wg is not None)


# ---------------------------------------------------------------------------
# Forward wrapper
# ---------------------------------------------------------------------------
def mlp_pallas(x, params, *, activation, clamp_min=-1.0, clamp_max=1.0,
               grn_eps=1e-12, alpha=1.0, tm=512, min_row_tiles=None,
               vmem_limit_bytes=None):
    """x: [..., H]; params: output of mlp_prepare."""
    H, I = params["hidden"], params["inter"]
    H_pad, I_pad, tn = params["h_pad"], params["i_pad"], params["tn"]
    w1_blk, w2p = params["w1_blocks"], params["w2"]
    assert (activation == "swiglu") == params["swiglu"]

    orig_shape = x.shape
    assert orig_shape[-1] == H
    x2 = x.reshape(-1, H)
    M = x2.shape[0]
    out_dtype = x.dtype
    w_dtype = w2p.dtype
    if vmem_limit_bytes is None:
        vmem_limit_bytes = _default_vmem_limit()

    # --- row tile selection -------------------------------------------------
    if min_row_tiles is None:
        min_row_tiles = _num_tensorcores()       # feed both v7x TensorCores
    M16 = _round_up(max(M, 1), 16)               # 16: bf16 sublane packing
    tm = max(16, min((tm // 16) * 16, M16))
    if min_row_tiles > 1 and M16 >= 16 * min_row_tiles:
        tm = min(tm, _round_up(-(-M16 // min_row_tiles), 16))
    M_pad = _round_up(M, tm)
    grid = (M_pad // tm, I_pad // tn)

    # x padded + pre-cast to the MXU dtype ONCE (no per-step cast in-kernel).
    xp = jnp.pad(x2, ((0, M_pad - M), (0, H_pad - H))).astype(w_dtype)

    wcols = w1_blk.shape[-1]                     # tn, or 2*tn for swiglu
    x_spec = pl.BlockSpec((tm, H_pad), lambda i, j: (i, 0))
    w1_spec = pl.BlockSpec((None, H_pad, wcols), lambda i, j: (j, 0, 0))
    w2_spec = pl.BlockSpec((tn, H_pad), lambda i, j: (j, 0))
    out_spec = pl.BlockSpec((tm, H_pad), lambda i, j: (i, 0))
    scratch = [pltpu.VMEM((tm, H_pad), jnp.float32)]

    if activation == "swiglu":
        kernel = partial(_mlp_swiglu_kernel, tn=tn)
    elif activation == "grn":
        kernel = partial(_mlp_grn_kernel, grn_eps=grn_eps)
        scratch.append(pltpu.VMEM((tm, 1), jnp.float32))     # sum(h^2) per row
    else:
        mask_tail = (I_pad != I) and (activation in _NONFINITE_AT_ZERO)
        kernel = partial(_mlp_act_kernel, activation=activation,
                         clamp_min=clamp_min, clamp_max=clamp_max, alpha=alpha,
                         tn=tn, i_size=I, mask_tail=mask_tail)

    out = pl.pallas_call(
        kernel,
        out_shape=jax.ShapeDtypeStruct((M_pad, H_pad), out_dtype),
        grid_spec=pltpu.PrefetchScalarGridSpec(
            num_scalar_prefetch=0, grid=grid,
            in_specs=[x_spec, w1_spec, w2_spec],
            out_specs=out_spec,
            scratch_shapes=scratch),
        compiler_params=pltpu.CompilerParams(
            dimension_semantics=("parallel", "arbitrary"),
            vmem_limit_bytes=vmem_limit_bytes),
    )(xp, w1_blk, w2p)

    return out[:M, :H].reshape(orig_shape)


# ---------------------------------------------------------------------------
# Pure-JAX reference (mirrors the PyTorch module forward, bias=False)
# ---------------------------------------------------------------------------
def mlp_ref(x, w1, w2, *, activation, wg=None, clamp_min=-1.0, clamp_max=1.0,
            grn_eps=1e-12, alpha=1.0):
    orig_shape = x.shape
    x2 = x.reshape(-1, orig_shape[-1])
    h = x2 @ w1
    if activation == "swiglu":
        a = (h * jax.nn.sigmoid(h)) * (x2 @ wg)
    elif activation == "grn":
        norm = jnp.sqrt(jnp.sum(h * h, axis=-1, keepdims=True))
        a = h / jnp.maximum(norm, grn_eps)
    else:
        a = _apply_activation(h, activation, clamp_min=clamp_min,
                              clamp_max=clamp_max, alpha=alpha)
    return (a @ w2).reshape(orig_shape[:-1] + (w2.shape[1],))


if __name__ == "__main__":
    # Small shapes consistent with the module: batch=2, seq=8, hidden=32, inter=64
    batch, seq, hidden, inter = 2, 8, 32, 64
    key = jax.random.PRNGKey(0)
    kx, k1, kg, k2 = jax.random.split(key, 4)

    x = jax.random.normal(kx, (batch, seq, hidden), dtype=jnp.float32)
    w1 = jax.random.normal(k1, (hidden, inter), jnp.float32) * 0.1
    wg = jax.random.normal(kg, (hidden, inter), jnp.float32) * 0.1
    w2 = jax.random.normal(k2, (inter, hidden), jnp.float32) * 0.1

    ok = True
    for act in ("swiglu", "gelu", "relu", "clamp", "grn", "sigmoid", "tanh"):
        params = mlp_prepare(w1, w2, wg=wg if act == "swiglu" else None)
        out = jax.block_until_ready(
            mlp_pallas(x, params, activation=act, clamp_min=-0.5, clamp_max=0.5,
                       grn_eps=1e-6))
        ref = mlp_ref(x, w1, w2, wg=wg, activation=act,
                      clamp_min=-0.5, clamp_max=0.5, grn_eps=1e-6)
        good = bool(np.allclose(np.asarray(out), np.asarray(ref),
                                rtol=2e-2, atol=2e-2))
        ok &= good

    # Multi-tile I reduction (I not a multiple of tn) + tail-mask path (log has
    # non-finite act(0) on padded columns) + grn tiled-I path.  Inputs are
    # pre-quantized to bf16 so the f32 reference and the bf16 MXU kernel see
    # identical operands and the check isolates the tiling/masking logic.
    hidden2, inter2 = 48, 320
    kxb, k1b, k2b = jax.random.split(jax.random.PRNGKey(1), 3)
    xb = (jnp.abs(jax.random.normal(kxb, (batch, seq, hidden2), jnp.float32)) + 0.1
          ).astype(jnp.bfloat16).astype(jnp.float32)
    w1b = (jnp.abs(jax.random.normal(k1b, (hidden2, inter2), jnp.float32)) * 0.1
           + 0.01).astype(jnp.bfloat16).astype(jnp.float32)
    w2b = (jax.random.normal(k2b, (inter2, hidden2), jnp.float32) * 0.1
           ).astype(jnp.bfloat16).astype(jnp.float32)
    params_b = mlp_prepare(w1b, w2b, tn=128)
    for act in ("log", "sigmoid", "grn"):
        out_b = jax.block_until_ready(mlp_pallas(xb, params_b, activation=act,
                                                 grn_eps=1e-6))
        ref_b = mlp_ref(xb, w1b, w2b, activation=act, grn_eps=1e-6)
        ok &= bool(np.allclose(np.asarray(out_b), np.asarray(ref_b),
                               rtol=2e-2, atol=2e-2))

    print("KERNEL_OK" if ok else "KERNEL_MISMATCH")
</pallas_src>

<mosaic_0001>
module attributes {stable_mosaic.version = 11 : i64} {
  func.func @_mlp_swiglu_kernel(%arg0: i32, %arg1: i32, %arg2: memref<16x128xbf16, #tpu.memory_space<vmem>>, %arg3: memref<1x128x256xbf16, #tpu.memory_space<vmem>>, %arg4: memref<128x128xbf16, #tpu.memory_space<vmem>>, %arg5: memref<16x128xf32, #tpu.memory_space<vmem>>, %arg6: memref<16x128xf32, #tpu.memory_space<vmem>>) attributes {dimension_semantics = [#tpu.dimension_semantics<parallel>, #tpu.dimension_semantics<arbitrary>], iteration_bounds = array<i64: 1, 1>, scalar_prefetch = 0 : i64, scratch_operands = 1 : i64, tpu.core_type = #tpu.core_type<tc>, window_params = [{transform_indices = @transform_0, window_bounds = array<i64: 16, 128>}, {transform_indices = @transform_1, window_bounds = array<i64: 1, 128, 256>}, {transform_indices = @transform_2, window_bounds = array<i64: 128, 128>}, {transform_indices = @transform_3, window_bounds = array<i64: 16, 128>}]} {
    %c0 = arith.constant 0 : index
    %c0_0 = arith.constant 0 : index
    %0 = vector.load %arg2[%c0, %c0_0] : memref<16x128xbf16, #tpu.memory_space<vmem>>, vector<16x128xbf16>
    %c0_1 = arith.constant 0 : index
    %c0_2 = arith.constant 0 : index
    %c0_3 = arith.constant 0 : index
    %1 = vector.load %arg3[%c0_1, %c0_2, %c0_3] : memref<1x128x256xbf16, #tpu.memory_space<vmem>>, vector<1x128x256xbf16>
    %2 = vector.shape_cast %1 : vector<1x128x256xbf16> to vector<128x256xbf16>
    %cst = arith.constant dense<0.000000e+00> : vector<16x256xf32>
    %3 = tpu.matmul %0, %2, %cst {dimension_numbers = #tpu.dot_dimension_numbers<[1], [0], [0], [1], [0, 0, 1, 1], [], []>} : vector<16x128xbf16>, vector<128x256xbf16>, vector<16x256xf32> -> vector<16x256xf32>
    %4 = vector.extract_strided_slice %3 {offsets = [0, 0], sizes = [16, 128], strides = [1, 1]} : vector<16x256xf32> to vector<16x128xf32>
    %5 = vector.extract_strided_slice %3 {offsets = [0, 128], sizes = [16, 128], strides = [1, 1]} : vector<16x256xf32> to vector<16x128xf32>
    %6 = arith.negf %4 : vector<16x128xf32>
    %7 = math.exp %6 : vector<16x128xf32>
    %cst_4 = arith.constant 1.000000e+00 : f32
    %8 = vector.broadcast %cst_4 : f32 to vector<16x128xf32>
    %9 = arith.addf %8, %7 : vector<16x128xf32>
    %10 = arith.divf %8, %9 : vector<16x128xf32>
    %11 = arith.mulf %4, %10 : vector<16x128xf32>
    %12 = arith.mulf %11, %5 : vector<16x128xf32>
    %13 = arith.truncf %12 : vector<16x128xf32> to vector<16x128xbf16>
    %c0_5 = arith.constant 0 : index
    %c0_6 = arith.constant 0 : index
    %14 = vector.load %arg4[%c0_5, %c0_6] : memref<128x128xbf16, #tpu.memory_space<vmem>>, vector<128x128xbf16>
    %cst_7 = arith.constant dense<0.000000e+00> : vector<16x128xf32>
    %15 = tpu.matmul %13, %14, %cst_7 {dimension_numbers = #tpu.dot_dimension_numbers<[1], [0], [0], [1], [0, 0, 1, 1], [], []>} : vector<16x128xbf16>, vector<128x128xbf16>, vector<16x128xf32> -> vector<16x128xf32>
    %c0_i32 = arith.constant 0 : i32
    %16 = arith.cmpi eq, %arg1, %c0_i32 : i32
    %17 = arith.extui %16 : i1 to i32
    %c0_i32_8 = arith.constant 0 : i32
    %18 = arith.cmpi ne, %17, %c0_i32_8 : i32
    scf.if %18 {
      %c0_13 = arith.constant 0 : index
      %c0_14 = arith.constant 0 : index
      %25 = vector.load %arg6[%c0_13, %c0_14] : memref<16x128xf32, #tpu.memory_space<vmem>>, vector<16x128xf32>
      tpu.vector_store %arg6[%c0_13, %c0_14], %15 {strides = array<i32>} : memref<16x128xf32, #tpu.memory_space<vmem>>, vector<16x128xf32>,
    } else {
    }
    %c0_i32_9 = arith.constant 0 : i32
    %19 = arith.cmpi sgt, %arg1, %c0_i32_9 : i32
    %20 = arith.extui %19 : i1 to i32
    %c0_i32_10 = arith.constant 0 : i32
    %21 = arith.cmpi ne, %20, %c0_i32_10 : i32
    scf.if %21 {
      %c0_13 = arith.constant 0 : index
      %c0_14 = arith.constant 0 : index
      %25 = vector.load %arg6[%c0_13, %c0_14] : memref<16x128xf32, #tpu.memory_space<vmem>>, vector<16x128xf32>
      %26 = arith.addf %25, %15 : vector<16x128xf32>
      %c0_15 = arith.constant 0 : index
      %c0_16 = arith.constant 0 : index
      %27 = vector.load %arg6[%c0_15, %c0_16] : memref<16x128xf32, #tpu.memory_space<vmem>>, vector<16x128xf32>
      tpu.vector_store %arg6[%c0_15, %c0_16], %26 {strides = array<i32>} : memref<16x128xf32, #tpu.memory_space<vmem>>, vector<16x128xf32>,
    } else {
    }
    %c0_i32_11 = arith.constant 0 : i32
    %22 = arith.cmpi eq, %arg1, %c0_i32_11 : i32
    %23 = arith.extui %22 : i1 to i32
    %c0_i32_12 = arith.constant 0 : i32
    %24 = arith.cmpi ne, %23, %c0_i32_12 : i32
    scf.if %24 {
      %c0_13 = arith.constant 0 : index
      %c0_14 = arith.constant 0 : index
      %25 = vector.load %arg6[%c0_13, %c0_14] : memref<16x128xf32, #tpu.memory_space<vmem>>, vector<16x128xf32>
      %c0_15 = arith.constant 0 : index
      %c0_16 = arith.constant 0 : index
      %26 = vector.load %arg5[%c0_15, %c0_16] : memref<16x128xf32, #tpu.memory_space<vmem>>, vector<16x128xf32>
      tpu.vector_store %arg5[%c0_15, %c0_16], %25 {strides = array<i32>} : memref<16x128xf32, #tpu.memory_space<vmem>>, vector<16x128xf32>,
    } else {
    }
    return
  }
  func.func @transform_0(%arg0: i32, %arg1: i32) -> (i32, i32) {
    %c0_i32 = arith.constant 0 : i32
    %c0_i32_0 = arith.constant 0 : i32
    return %arg0, %c0_i32 : i32, i32
  }
  func.func @transform_1(%arg0: i32, %arg1: i32) -> (i32, i32, i32) {
    %c0_i32 = arith.constant 0 : i32
    %c0_i32_0 = arith.constant 0 : i32
    %c0_i32_1 = arith.constant 0 : i32
    return %arg1, %c0_i32, %c0_i32_0 : i32, i32, i32
  }
  func.func @transform_2(%arg0: i32, %arg1: i32) -> (i32, i32) {
    %c0_i32 = arith.constant 0 : i32
    %c0_i32_0 = arith.constant 0 : i32
    return %arg1, %c0_i32 : i32, i32
  }
  func.func @transform_3(%arg0: i32, %arg1: i32) -> (i32, i32) {
    %c0_i32 = arith.constant 0 : i32
    %c0_i32_0 = arith.constant 0 : i32
    return %arg0, %c0_i32 : i32, i32
  }
}

</mosaic_0001>

<bundles_post_ra>
// kernel: tpu_custom_call.1
= control target key start
LH: loop header
LB: loop body
LE: loop exit
PB: predicated region body
PF: predicated region fallthrough
CT: control target
= control target key end

     0   :  { %8 = vsyncpa [#allocation4], 0  ;;  %s610_s0 = inlined_call_operand.hbm [shape: bf16[16,128], index: 0, kind: input, shape index: {}]   ;;  %s611_s1 = inlined_call_operand.hbm [shape: bf16[1,128,256], index: 1, kind: input, shape index: {}]   ;;  %s612_s2 = inlined_call_operand.hbm [shape: bf16[128,128], index: 2, kind: input, shape index: {}]   ;;  %s613_s3 = inlined_call_operand.hbm [shape: f32[16,128], index: 3, kind: output, shape index: {}]  }
   0x1   :  { %9 = vsyncpa [#allocation7], 0 }
   0x2   :  { %10 = vsyncpa [#allocation5], 0  ;;  %s561_s12 = smov [#allocation6]  }
   0x3   :  { %s28_s13 = sshll.u32 %s561_s12, 4  ;;  %s29_s13 = int_to_ptr.vmem [resolvable:$true] %s28_s13 }
   0x4   :  { %s483_s14 = scalar_lea.vmem %s29_s13, 2048  ;;  %p488_p1 = scmp.lt.s32.totalorder %s29_s13, %s29_s13 }
   0x5   :  { %p484_p0 = scmp.ne.s32.totalorder %s29_s13, %s483_s14  ;;  %p489_p2 = scmp.lt.s32.totalorder %s483_s14, %s483_s14 }
   0x7   :  { %p490_p3 = por %p489_p2, %p488_p1 }
   0x9   :  { %p491_p4 = pnand %p490_p3, %p484_p0 }
   0xb   :  { %494 = shalt.err (!%p491_p4)
}
   0xc   :  { %s562_s15 = smov 128   ;;  %s563_s16 = smov 8  }
   0xd   :  { %34 = dma.hbm_to_vmem [thread:$0]  %s611_s1, 2048, %s29_s13, [#allocation7], %s562_s15, %s562_s15, %s563_s16  }
   0xe   :  { %s564_s19 = smov [#allocation3]  }
   0xf   :  { %s16_s20 = sshll.u32 %s564_s19, 4  ;;  %s17_s20 = int_to_ptr.vmem [resolvable:$true] %s16_s20 }
  0x10   :  { %s503_s21 = scalar_lea.vmem %s17_s20, 128  ;;  %p508_p6 = scmp.lt.s32.totalorder %s17_s20, %s17_s20 }
  0x11   :  { %p504_p5 = scmp.ne.s32.totalorder %s17_s20, %s503_s21  ;;  %p509_p7 = scmp.lt.s32.totalorder %s503_s21, %s503_s21 }
  0x13   :  { %p510_p8 = por %p509_p7, %p508_p6 }
  0x15   :  { %p511_p9 = pnand %p510_p8, %p504_p5 }
  0x17   :  { %514 = shalt.err (!%p511_p9)
}
  0x18   :  { %s565_s22 = smov 64   ;;  %s566_s23 = smov 4  }
  0x19   :  { %22 = dma.hbm_to_vmem [thread:$0]  %s610_s0, 128, %s17_s20, [#allocation4], %s565_s22, %s565_s22, %s566_s23  }
  0x1a   :  { %s567_s26 = smov [#allocation8]  }
  0x1b   :  { %s40_s27 = sshll.u32 %s567_s26, 4  ;;  %s41_s27 = int_to_ptr.vmem [resolvable:$true] %s40_s27 }
  0x1c   :  { %s523_s1 = scalar_lea.vmem %s41_s27, 1024  ;;  %p528_p11 = scmp.lt.s32.totalorder %s41_s27, %s41_s27 }
  0x1d   :  { %p524_p10 = scmp.ne.s32.totalorder %s41_s27, %s523_s1  ;;  %p529_p12 = scmp.lt.s32.totalorder %s523_s1, %s523_s1 }
  0x1f   :  { %p530_p13 = por %p529_p12, %p528_p11 }
  0x21   :  { %p531_p0 = pnand %p530_p13, %p524_p10 }
  0x23   :  { %534 = shalt.err (!%p531_p0)
}
  0x24   :  { %46 = dma.hbm_to_vmem [thread:$0]  %s612_s2, 1024, %s41_s27, [#allocation7], %s565_s22, %s565_s22, %s566_s23  }
  0x25   :  { %555 = dma.done.wait [#allocation4], 128  }
  0x26   :  { %556 = vsyncadd [#allocation4], 4294967168 }
  0x27   :  { %557 = dma.done.wait [#allocation7], 3072  }
  0x28   :  { %558 = vsyncadd [#allocation7], 4294964224  ;;  %v568_v0 = vmov 0   ;;  %v434_v1 = vld [vmem:[#allocation6 + $0x74] ss:$8 sps:$4 sm:$0xff]   ;;  %v569_v19 = vmov 0.0  }
  0x29   :  { %193 = vmatprep.mubr.bf16.mxu0 %v568_v0  ;;  %v436_v2 = vld [vmem:[#allocation6 + $0x70] ss:$8 sps:$4 sm:$0xff]   ;;  %161 = vmatprep.subr.bf16.mxu0 %v434_v1  ;;  %v437_v3 = vld [vmem:[#allocation6 + $0x64] ss:$8 sps:$4 sm:$0xff]   ;;  %v439_v4 = vld [vmem:[#allocation6 + $0x60] ss:$8 sps:$4 sm:$0xff]  }
  0x2a   :  { %162 = vmatpush1.bf16.msra.mxu0 %v436_v2  ;;  %v440_v5 = vld [vmem:[#allocation6 + $0x54] ss:$8 sps:$4 sm:$0xff]   ;;  %v442_v6 = vld [vmem:[#allocation6 + $0x50] ss:$8 sps:$4 sm:$0xff]   ;;  %v443_v7 = vld [vmem:[#allocation6 + $0x44] ss:$8 sps:$4 sm:$0xff]   ;;  %403 = vmatprep.subr.bf16.mxu1 %v569_v19 }
  0x2b   :  { %163 = vmatprep.subr.bf16.mxu0 %v437_v3  ;;  %v445_v8 = vld [vmem:[#allocation6 + $0x40] ss:$8 sps:$4 sm:$0xff]   ;;  %v446_v9 = vld [vmem:[#allocation6 + $0x34] ss:$8 sps:$4 sm:$0xff]   ;;  %v448_v10 = vld [vmem:[#allocation6 + $0x30] ss:$8 sps:$4 sm:$0xff]  }
  0x2c   :  { %v449_v11 = vld [vmem:[#allocation6 + $0x24] ss:$8 sps:$4 sm:$0xff]   ;;  %v451_v12 = vld [vmem:[#allocation6 + $0x20] ss:$8 sps:$4 sm:$0xff]   ;;  %v452_v13 = vld [vmem:[#allocation6 + $0x14] ss:$8 sps:$4 sm:$0xff]  }
  0x2d   :  { %v454_v14 = vld [vmem:[#allocation6 + $0x10] ss:$8 sps:$4 sm:$0xff]   ;;  %v455_v15 = vld [vmem:[#allocation6 + $0x4] ss:$8 sps:$4 sm:$0xff]   ;;  %v457_v16 = vld [vmem:[#allocation6] ss:$8 sps:$4 sm:$0xff]  }
  0x2e   :  { %164 = vmatpush1.bf16.msra.mxu0 %v439_v4  ;;  %v458_v17 = vld [vmem:[#allocation3] sm:$0xff]   ;;  %v460_v20 = vld [vmem:[#allocation8 + $0x30] sm:$0xff]   ;;  %v461_v21 = vld [vmem:[#allocation8 + $0x28] sm:$0xff]   ;;  %vm570_vm0 = vmmov 0   ;;  %s571_s0 = smov [#allocation9]  }
  0x2f   :  { %165 = vmatprep.subr.bf16.mxu0 %v440_v5  ;;  %v459_v18 = vld [vmem:[#allocation8 + $0x38] sm:$0xff]   ;;  %v462_v22 = vld [vmem:[#allocation8 + $0x20] sm:$0xff]   ;;  %v464_v24 = vld [vmem:[#allocation8 + $0x10] sm:$0xff]   ;;  %419 = vmatprep.mubr.msk.bf16.mxu1 %vm570_vm0, %v569_v19  ;;  %s354_s2 = sshll.u32 %s571_s0, 4  ;;  %s355_s2 = int_to_ptr.vmem [resolvable:$true] %s354_s2 }
  0x30   :  { %404 = vmatpush3.bf16.msra.mxu1 %v459_v18  ;;  %v463_v23 = vld [vmem:[#allocation8 + $0x18] sm:$0xff]   ;;  %v465_v25 = vld [vmem:[#allocation8 + $0x8] sm:$0xff]   ;;  %v466_v26 = vld [vmem:[#allocation8] sm:$0xff]   ;;  %s535_s30 = scalar_lea.vmem %s355_s2, 256  ;;  %p540_p2 = scmp.lt.s32.totalorder %s355_s2, %s355_s2 }
  0x31   :  { %405 = vmatprep.subr.bf16.mxu1 %v569_v19  ;;  %p536_p1 = scmp.ne.s32.totalorder %s355_s2, %s535_s30  ;;  %p541_p3 = scmp.lt.s32.totalorder %s535_s30, %s535_s30 }
  0x32   :  { %166 = vmatpush1.bf16.msra.mxu0 %v442_v6 }
  0x33   :  { %167 = vmatprep.subr.bf16.mxu0 %v443_v7  ;;  %p542_p4 = por %p541_p3, %p540_p2 }
  0x34   :  { %406 = vmatpush3.bf16.msra.mxu1 %v460_v20 }
  0x35   :  { %407 = vmatprep.subr.bf16.mxu1 %v569_v19  ;;  %p543_p5 = pnand %p542_p4, %p536_p1 }
  0x36   :  { %168 = vmatpush1.bf16.msra.mxu0 %v445_v8 }
  0x37   :  { %169 = vmatprep.subr.bf16.mxu0 %v446_v9 }
  0x38   :  { %408 = vmatpush3.bf16.msra.mxu1 %v461_v21 }
  0x39   :  { %409 = vmatprep.subr.bf16.mxu1 %v569_v19 }
  0x3a   :  { %170 = vmatpush1.bf16.msra.mxu0 %v448_v10 }
  0x3b   :  { %171 = vmatprep.subr.bf16.mxu0 %v449_v11 }
  0x3c   :  { %410 = vmatpush3.bf16.msra.mxu1 %v462_v22 }
  0x3d   :  { %411 = vmatprep.subr.bf16.mxu1 %v569_v19 }
  0x3e   :  { %172 = vmatpush1.bf16.msra.mxu0 %v451_v12 }
  0x3f   :  { %173 = vmatprep.subr.bf16.mxu0 %v452_v13 }
  0x40   :  { %412 = vmatpush3.bf16.msra.mxu1 %v463_v23 }
  0x41   :  { %413 = vmatprep.subr.bf16.mxu1 %v569_v19 }
  0x42   :  { %174 = vmatpush1.bf16.msra.mxu0 %v454_v14 }
  0x43   :  { %175 = vmatprep.subr.bf16.mxu0 %v455_v15 }
  0x44   :  { %414 = vmatpush3.bf16.msra.mxu1 %v464_v24 }
  0x45   :  { %415 = vmatprep.subr.bf16.mxu1 %v569_v19 }
  0x46   :  { %176 = vmatpush1.bf16.msra.mxu0 %v457_v16 }
  0x48   :  { %416 = vmatpush3.bf16.msra.mxu1 %v465_v25 }
  0x49   :  { %194 = vmatmul.mubr.bf16.vlgmr.msra.gmra.mxu0 %v458_v17  ;;  %417 = vmatprep.subr.bf16.mxu1 %v569_v19 }
  0x4c   :  { %418 = vmatpush3.bf16.msra.mxu1 %v466_v26 }
 0x109   :  { %v195_v27 = vpop.f32.mrf.mxu0 }
 0x10a   :  { %v384_v28 = vmul.f32 -1.442695, %v195_v27 }
 0x10b   :  { %v197_v29 = vpop.f32.mrf.mxu0 }
 0x10c   :  { %467 = vpow2.f32 %v384_v28 }
 0x10d   :  { %v199_v30 = vpop.f32.mrf.mxu0 }
 0x10e   :  { %v385_v31 = vmul.f32 -1.442695, %v199_v30 }
 0x10f   :  { %v201_v40 = vpop.f32.mrf.mxu0 }
 0x110   :  { %469 = vpow2.f32 %v385_v31 }
 0x119   :  { %v468_v32 = vpop.eup %467 }
 0x11a   :  { %v210_v33 = vadd.f32 1.0, %v468_v32 }
 0x11c   :  { %471 = vrcp.f32 %v210_v33 }
 0x11d   :  { %v470_v34 = vpop.eup %469 }
 0x11e   :  { %v211_v35 = vadd.f32 1.0, %v470_v34 }
 0x120   :  { %473 = vrcp.f32 %v211_v35 }
 0x129   :  { %v472_v36 = vpop.eup %471 }
 0x12a   :  { %v216_v37 = vmul.f32 %v472_v36, %v195_v27 }
 0x12c   :  { %v218_v41 = vmul.f32 %v216_v37, %v197_v29 }
 0x12d   :  { %v474_v38 = vpop.eup %473 }
 0x12e   :  { %v217_v39 = vmul.f32 %v474_v38, %v199_v30 }
 0x130   :  { %v219_v42 = vmul.f32 %v217_v39, %v201_v40 }
 0x132   :  { %v220_v43 = vpack.c.bf16 %v219_v42, %v218_v41 }
 0x134   :  { %420 = vmatmul.mubr.bf16.vlgmr.msra.gmra.mxu1 %v220_v43 }
 0x1f4   :  { %v319_v44 = vpop.f32.mrf.mxu1 }
 0x1f5   :  { %347 = vst [vmem:[#allocation9] sm:$0xff] %v319_v44 }
 0x1f6   :  { %v421_v45 = vpop.f32.mrf.mxu1 }
 0x1f8   :  { %v322_v46 = vpop.f32.mrf.mxu1 }
 0x1f9   :  { %348 = vst [vmem:[#allocation9 + $0x8] sm:$0xff] %v322_v46 }
 0x1fa   :  { %v422_v47 = vpop.f32.mrf.mxu1 }
 0x1fb   :  { %546 = shalt.err (!%p543_p5)
}
 0x1fc   :  { %360 = dma.vmem_to_hbm [thread:$0]  %s355_s2, 256, %s613_s3, [#allocation5], %s562_s15, %s562_s15, %s563_s16  }
 0x1fd   :  { %559 = dma.done.wait [#allocation5], 256  }
 0x1fe   :  { %560 = vsyncadd [#allocation5], 4294967040 }
 0x1ff   :  { %364 = vsyncpa [#allocation4], 1 }
 0x200   :  { %365 = vsyncpa [#allocation7], 1 }
 0x201   :  { %366 = vsyncpa [#allocation5], 1 }

</bundles_post_ra>
